<compile_context>
chip_gen: v7x
topology: tpu7x:2x2x1
jax: 0.10.0
libtpu: 0.0.40
codegen_flags: <defaults>
</compile_context>

<pallas_src>
import jax
import jax.numpy as jnp
from jax.experimental import pallas as pl
from jax.experimental.pallas import tpu as pltpu


def _round_up(x, m):
    return ((x + m - 1) // m) * m


# ---------------------------------------------------------------------------
# Kernels
# ---------------------------------------------------------------------------

def _embedding_kernel_natural(ids_ref, table_ref, out_ref):
    """Gather TILE rows via one_hot(tile, vocab_p) @ table(vocab_p, embd).

    ids_ref:   (tile, 1)        int32  token ids (sublane-major column)
    table_ref: (vocab_p, embd)  VMEM-resident padded table (embd % 128 == 0)
    out_ref:   (tile, embd)     lane-dense output tile
    """
    ids = ids_ref[...]                                            # (tile, 1)
    tile = ids.shape[0]
    vocab_p = table_ref.shape[0]
    # Lane-axis iota; the compare broadcasts the (tile, 1) ids across lanes.
    # The iota is regenerated per grid step but is VPU filler under the MXU op.
    col = jax.lax.broadcasted_iota(jnp.int32, (tile, vocab_p), 1)
    one_hot = (col == ids).astype(table_ref.dtype)                # (tile, vocab_p)
    out_ref[...] = jnp.dot(
        one_hot, table_ref[...], preferred_element_type=jnp.float32
    ).astype(out_ref.dtype)


def _embedding_kernel_transposed(ids_ref, table_t_ref, out_ref):
    """Small-embd path: table_T(embd, vocab_p) @ one_hot_T(vocab_p, tile).

    Kept only for embd_dim < 128 so the output last dim stays lane-dense.
    (With embd_dim this small the kernel is bound by the one-hot build, not
    the tiny matmul, so routing through the MXU is harmless filler.)

    ids_ref:     (1, tile)        int32  token ids (lane-major row)
    table_t_ref: (embd, vocab_p)  VMEM-resident padded, transposed table
    out_ref:     (embd, tile)     lane-dense transposed output tile
    """
    ids = ids_ref[...]                                            # (1, tile)
    tile = ids.shape[1]
    vocab_p = table_t_ref.shape[1]
    row = jax.lax.broadcasted_iota(jnp.int32, (vocab_p, tile), 0)
    one_hot_t = (row == ids).astype(table_t_ref.dtype)            # (vocab_p, tile)
    out_ref[...] = jnp.dot(
        table_t_ref[...], one_hot_t, preferred_element_type=jnp.float32
    ).astype(out_ref.dtype)


# ---------------------------------------------------------------------------
# One-time table preparation (hoisted out of the forward hot path)
# ---------------------------------------------------------------------------

def prepare_embedding_table(table, *, dtype=None, vocab_align=256):
    """Pad (and, for embd_dim < 128, transpose) the table once.

    Vocab is padded to a multiple of `vocab_align` for clean (8,128)/MXU-K
    tiling; padded rows are zero and never selected by in-range ids.
    `dtype=jnp.bfloat16` halves the resident footprint (rows are still exact
    bf16 copies since one-hot entries are 0/1).
    """
    num_pts, embd_dim = table.shape
    if dtype is not None:
        table = table.astype(dtype)
    vocab_p = _round_up(num_pts, vocab_align)
    natural = (embd_dim % 128 == 0)
    if natural:
        tbl = jnp.zeros((vocab_p, embd_dim), table.dtype).at[:num_pts, :].set(table)
    else:
        tbl = jnp.zeros((embd_dim, vocab_p), table.dtype).at[:, :num_pts].set(table.T)
    return dict(table=tbl, natural=natural, num_pts=num_pts,
                embd_dim=embd_dim, vocab_p=vocab_p)


# ---------------------------------------------------------------------------
# Forward
# ---------------------------------------------------------------------------

def embedding_forward(batch_ids, prepared, *, max_tile=1024):
    """Pallas equivalent of Embedding.forward(batch_ids)."""
    tbl = prepared["table"]
    natural = prepared["natural"]
    embd_dim = prepared["embd_dim"]
    vocab_p = prepared["vocab_p"]
    out_dtype = tbl.dtype
    itemsize = tbl.dtype.itemsize

    orig_shape = batch_ids.shape
    ids_flat = batch_ids.reshape(-1).astype(jnp.int32)
    n = int(ids_flat.shape[0])

    # Token-axis tile: multiple of 128; prefer >= 2 grid steps so the
    # "parallel" axis can be split across v7x's two TensorCores.
    n128 = _round_up(max(n, 1), 128)
    tile = min(max_tile, n128)
    if n128 > 128 and n128 // tile < 2:
        tile = max(128, _round_up(n128 // 2, 128))
    n_pad = _round_up(n, tile)
    grid = (n_pad // tile,)

    # VMEM budget: resident table (single copy) + double-buffered ids/output
    # blocks + one-hot working set.  Set the scoped limit explicitly rather
    # than relying on the 16/32 MiB defaults.  (For tables large enough that
    # this approaches physical VMEM, use the DMA-gather path — see TODO.)
    table_bytes = tbl.size * itemsize
    if natural:
        ids_blk_bytes = (tile // 8) * 8 * 128 * 4       # (tile,1) i32, (8,128)-tiled
        out_blk_bytes = tile * embd_dim * itemsize
    else:
        ids_blk_bytes = 8 * tile * 4                    # (1,tile) i32
        out_blk_bytes = _round_up(embd_dim, 8) * tile * itemsize
    onehot_bytes = vocab_p * tile * itemsize
    est = table_bytes + 2 * ids_blk_bytes + 2 * out_blk_bytes + onehot_bytes
    vmem_limit = int(min(100 * 2**20, max(32 * 2**20, 2 * est)))

    cost = pl.CostEstimate(
        flops=2 * n_pad * vocab_p * embd_dim,
        transcendentals=0,
        bytes_accessed=n_pad * 4 + table_bytes + n_pad * embd_dim * itemsize,
    )
    compiler_params = pltpu.CompilerParams(
        dimension_semantics=("parallel",),
        vmem_limit_bytes=vmem_limit,
    )
    # Whole-array table in VMEM: one resident copy, no per-step DMA, no
    # double-buffering of a constant block.
    table_spec = pl.BlockSpec(memory_space=pltpu.MemorySpace.VMEM)

    if natural:
        # Natural orientation: no wrapper-side table/output transposes.
        ids_p = jnp.zeros((n_pad, 1), jnp.int32).at[:n, 0].set(ids_flat)
        out = pl.pallas_call(
            _embedding_kernel_natural,
            out_shape=jax.ShapeDtypeStruct((n_pad, embd_dim), out_dtype),
            grid_spec=pltpu.PrefetchScalarGridSpec(
                num_scalar_prefetch=0,
                grid=grid,
                in_specs=[
                    pl.BlockSpec((tile, 1), lambda i: (i, 0)),   # ids tile
                    table_spec,                                  # resident table
                ],
                out_specs=pl.BlockSpec((tile, embd_dim), lambda i: (i, 0)),
            ),
            compiler_params=compiler_params,
            cost_estimate=cost,
        )(ids_p, tbl)
        return out[:n].reshape(orig_shape + (embd_dim,))

    # embd_dim < 128: transposed formulation keeps the kernel output lane-dense.
    ids_p = jnp.zeros((1, n_pad), jnp.int32).at[0, :n].set(ids_flat)
    out_t = pl.pallas_call(
        _embedding_kernel_transposed,
        out_shape=jax.ShapeDtypeStruct((embd_dim, n_pad), out_dtype),
        grid_spec=pltpu.PrefetchScalarGridSpec(
            num_scalar_prefetch=0,
            grid=grid,
            in_specs=[
                pl.BlockSpec((1, tile), lambda i: (0, i)),       # ids tile
                table_spec,                                      # resident table
            ],
            out_specs=pl.BlockSpec((embd_dim, tile), lambda i: (0, i)),
        ),
        compiler_params=compiler_params,
        cost_estimate=cost,
    )(ids_p, tbl)
    # Back to PyTorch layout (layout plumbing outside the kernel).
    return out_t[:, :n].T.reshape(orig_shape + (embd_dim,))


def embedding_apply(batch_ids, table, **kwargs):
    """One-shot convenience (prepares the table each call; prefer preparing once)."""
    return embedding_forward(batch_ids, prepare_embedding_table(table), **kwargs)


if __name__ == "__main__":
    key = jax.random.PRNGKey(0)
    k_table, k_ids, k_table2 = jax.random.split(key, 3)

    # Module defaults: embd_dim=5, num_pts=200; nn.Embedding init ~ N(0, 1).
    embd_dim, num_pts = 5, 200
    table = jax.random.normal(k_table, (num_pts, embd_dim), dtype=jnp.float32)
    batch_ids = jax.random.randint(k_ids, (2, 8), 0, num_pts, dtype=jnp.int32)

    prepared = prepare_embedding_table(table)           # hoisted, done once
    out = jax.block_until_ready(embedding_forward(batch_ids, prepared))
    ref = jnp.take(table, batch_ids, axis=0)
    assert out.shape == (2, 8, embd_dim)
    assert jnp.allclose(out, ref, atol=1e-6), "mismatch vs reference (transposed path)"

    # Also exercise the natural-orientation path (embd_dim % 128 == 0).
    embd_dim2 = 128
    table2 = jax.random.normal(k_table2, (num_pts, embd_dim2), dtype=jnp.float32)
    prepared2 = prepare_embedding_table(table2)
    out2 = jax.block_until_ready(embedding_forward(batch_ids, prepared2))
    ref2 = jnp.take(table2, batch_ids, axis=0)
    assert out2.shape == (2, 8, embd_dim2)
    assert jnp.allclose(out2, ref2, atol=1e-6), "mismatch vs reference (natural path)"

    print("KERNEL_OK")
</pallas_src>

<mosaic_0001>
module attributes {stable_mosaic.version = 11 : i64} {
  func.func @_embedding_kernel_transposed(%arg0: i32, %arg1: memref<1x128xi32, #tpu.memory_space<vmem>>, %arg2: memref<5x256xf32, #tpu.memory_space<vmem>>, %arg3: memref<5x128xf32, #tpu.memory_space<vmem>>) attributes {dimension_semantics = [#tpu.dimension_semantics<parallel>], iteration_bounds = array<i64: 1>, scalar_prefetch = 0 : i64, scratch_operands = 0 : i64, tpu.core_type = #tpu.core_type<tc>, window_params = [{transform_indices = @transform_0, window_bounds = array<i64: 1, 128>}, {pipeline_mode = #tpu.pipeline_mode<synchronous>, transform_indices = @transform_1, window_bounds = array<i64: 5, 256>}, {transform_indices = @transform_2, window_bounds = array<i64: 5, 128>}]} {
    %c0 = arith.constant 0 : index
    %c0_0 = arith.constant 0 : index
    %0 = vector.load %arg1[%c0, %c0_0] : memref<1x128xi32, #tpu.memory_space<vmem>>, vector<1x128xi32>
    %1 = tpu.iota {dimensions = array<i32: 0>} : vector<256x128xi32>
    %2 = vector.broadcast %0 : vector<1x128xi32> to vector<256x128xi32>
    %3 = arith.cmpi eq, %1, %2 : vector<256x128xi32>
    %4 = arith.extui %3 : vector<256x128xi1> to vector<256x128xi32>
    %5 = arith.sitofp %4 : vector<256x128xi32> to vector<256x128xf32>
    %c0_1 = arith.constant 0 : index
    %c0_2 = arith.constant 0 : index
    %6 = vector.load %arg2[%c0_1, %c0_2] : memref<5x256xf32, #tpu.memory_space<vmem>>, vector<5x256xf32>
    %cst = arith.constant dense<0.000000e+00> : vector<5x128xf32>
    %7 = tpu.matmul %6, %5, %cst {dimension_numbers = #tpu.dot_dimension_numbers<[1], [0], [0], [1], [0, 0, 1, 1], [], []>} : vector<5x256xf32>, vector<256x128xf32>, vector<5x128xf32> -> vector<5x128xf32>
    %c0_3 = arith.constant 0 : index
    %c0_4 = arith.constant 0 : index
    %8 = vector.load %arg3[%c0_3, %c0_4] : memref<5x128xf32, #tpu.memory_space<vmem>>, vector<5x128xf32>
    tpu.vector_store %arg3[%c0_3, %c0_4], %7 {strides = array<i32>} : memref<5x128xf32, #tpu.memory_space<vmem>>, vector<5x128xf32>,
    return
  }
  func.func @transform_0(%arg0: i32) -> (i32, i32) {
    %c0_i32 = arith.constant 0 : i32
    %c0_i32_0 = arith.constant 0 : i32
    return %c0_i32, %arg0 : i32, i32
  }
  func.func @transform_1(%arg0: i32) -> (i32, i32) {
    %c0_i32 = arith.constant 0 : i32
    %c0_i32_0 = arith.constant 0 : i32
    %c0_i32_1 = arith.constant 0 : i32
    return %c0_i32, %c0_i32_0 : i32, i32
  }
  func.func @transform_2(%arg0: i32) -> (i32, i32) {
    %c0_i32 = arith.constant 0 : i32
    %c0_i32_0 = arith.constant 0 : i32
    return %c0_i32, %arg0 : i32, i32
  }
}

</mosaic_0001>

<bundles_post_ra>
// kernel: tpu_custom_call.1
= control target key start
LH: loop header
LB: loop body
LE: loop exit
PB: predicated region body
PF: predicated region fallthrough
CT: control target
= control target key end

     0   :  { %7 = vsyncpa [#allocation3], 0  ;;  %s606_s0 = inlined_call_operand.hbm [shape: s32[1,128], index: 0, kind: input, shape index: {}]   ;;  %s607_s1 = inlined_call_operand.hbm [shape: f32[5,256], index: 1, kind: input, shape index: {}]   ;;  %s608_s2 = inlined_call_operand.hbm [shape: f32[5,128], index: 2, kind: output, shape index: {}]  }
   0x1   :  { %8 = vsyncpa [#allocation6], 0 }
   0x2   :  { %9 = vsyncpa [#allocation4], 0  ;;  %s467_s9 = smov [#allocation2]   ;;  %s468_s11 = smov [#allocation5]  }
   0x3   :  { %s16_s10 = sshll.u32 %s467_s9, 4  ;;  %s26_s12 = sshll.u32 %s468_s11, 4  ;;  %s17_s10 = int_to_ptr.vmem [resolvable:$true] %s16_s10  ;;  %s27_s12 = int_to_ptr.vmem [resolvable:$true] %s26_s12 }
   0x4   :  { %s395_s15 = scalar_lea.hbm %s606_s0, 16 }
   0x5   :  { %p396_p0 = scmp.ne.s32.totalorder %s606_s0, %s395_s15  ;;  %p399_p1 = scmp.lt.u32.totalorder %s395_s15, %s606_s0 }
   0x7   :  { %p401_p2 = pnand %p399_p1, %p396_p0 }
   0x9   :  { %404 = shalt.err (!%p401_p2)
}
   0xa   :  { %s405_s20 = scalar_lea.vmem %s17_s10, 16  ;;  %s409_s21 = scalar_lea.vmem %s17_s10, 32 }
   0xb   :  { %p406_p3 = scmp.ne.s32.totalorder %s17_s10, %s405_s20  ;;  %p410_p4 = scmp.lt.s32.totalorder %s17_s10, %s17_s10 }
   0xc   :  { %p411_p5 = scmp.lt.s32.totalorder %s409_s21, %s405_s20 }
   0xe   :  { %p412_p6 = por %p411_p5, %p410_p4 }
  0x10   :  { %p413_p7 = pnand %p412_p6, %p406_p3 }
  0x12   :  { %416 = shalt.err (!%p413_p7)
}
  0x13   :  { %19 = dma.hbm_to_vmem [thread:$0]  %s606_s0, 16, %s17_s10, [#allocation3]  }
  0x14   :  { %s417_s26 = scalar_lea.hbm %s607_s1, 256 }
  0x15   :  { %p418_p8 = scmp.ne.s32.totalorder %s607_s1, %s417_s26  ;;  %p421_p9 = scmp.lt.u32.totalorder %s417_s26, %s607_s1 }
  0x17   :  { %p423_p10 = pnand %p421_p9, %p418_p8 }
  0x19   :  { %426 = shalt.err (!%p423_p10)
}
  0x1a   :  { %s427_s3 = scalar_lea.vmem %s27_s12, 256  ;;  %p432_p12 = scmp.lt.s32.totalorder %s27_s12, %s27_s12 }
  0x1b   :  { %p428_p11 = scmp.ne.s32.totalorder %s27_s12, %s427_s3  ;;  %p433_p13 = scmp.lt.s32.totalorder %s427_s3, %s427_s3 }
  0x1d   :  { %p434_p0 = por %p433_p13, %p432_p12 }
  0x1f   :  { %p435_p1 = pnand %p434_p0, %p428_p11 }
  0x21   :  { %438 = shalt.err (!%p435_p1)
}
  0x22   :  { %29 = dma.hbm_to_vmem [thread:$0]  %s607_s1, 256, %s27_s12, [#allocation6]  }
  0x23   :  { %461 = dma.done.wait [#allocation3], 16  }
  0x24   :  { %462 = vsyncadd [#allocation3], 4294967280 }
  0x25   :  { %463 = dma.done.wait [#allocation6], 256  }
  0x26   :  { %464 = vsyncadd [#allocation6], 4294967040  ;;  %v37_v0 = vlaneseq  ;;  %v521_v11 = vld [vmem:[#allocation2] ss:$0 sm:$0xff]  ;;  %v171_v14 = vld [vmem:[#allocation5 + $0x8] sm:$0x1f] }
  0x27   :  { %236 = vmatprep.mubr.f32.mxu0 %v171_v14  ;;  %v469_v15 = vmov 1.0|1.0   ;;  %v170_v36 = vld [vmem:[#allocation5] sm:$0x1f]  ;;  %s470_s1 = smov [#allocation7]  }
  0x28   :  { %v510_v1 = vshrl.u32 %v37_v0, 7  ;;  %s249_s5 = sshll.u32 %s470_s1, 4  ;;  %s250_s5 = int_to_ptr.vmem [resolvable:$true] %s249_s5 }
  0x29   :  { %s439_s6 = scalar_lea.vmem %s250_s5, 128  ;;  %p444_p3 = scmp.lt.s32.totalorder %s250_s5, %s250_s5 }
  0x2a   :  { %v54_v2 = vadd.s32 128, %v510_v1  ;;  %v55_v3 = vadd.s32 136, %v510_v1  ;;  %v39_v4 = vadd.s32 8, %v510_v1  ;;  %v56_v5 = vadd.s32 144, %v510_v1  ;;  %p440_p2 = scmp.ne.s32.totalorder %s250_s5, %s439_s6  ;;  %p445_p4 = scmp.lt.s32.totalorder %s439_s6, %s439_s6 }
  0x2b   :  { %v57_v6 = vadd.s32 152, %v510_v1  ;;  %v40_v7 = vadd.s32 16, %v510_v1  ;;  %v41_v8 = vadd.s32 24, %v510_v1  ;;  %v58_v9 = vadd.s32 160, %v510_v1 }
  0x2c   :  { %v59_v10 = vadd.s32 168, %v510_v1  ;;  %v42_v12 = vadd.s32 32, %v510_v1  ;;  %v43_v13 = vadd.s32 40, %v510_v1  ;;  %vm90_vm0 = vcmp.eq.s32.totalorder %v54_v2, %v521_v11  ;;  %p446_p5 = por %p445_p4, %p444_p3 }
  0x2d   :  { %vm91_vm1 = vcmp.eq.s32.totalorder %v55_v3, %v521_v11  ;;  %vm74_vm2 = vcmp.eq.s32.totalorder %v510_v1, %v521_v11  ;;  %vm75_vm3 = vcmp.eq.s32.totalorder %v39_v4, %v521_v11  ;;  %vm92_vm5 = vcmp.eq.s32.totalorder %v56_v5, %v521_v11 }
  0x2e   :  { %vm359_vm4 = vmpackc.low %vm91_vm1, %vm90_vm0  ;;  %vm93_vm6 = vcmp.eq.s32.totalorder %v57_v6, %v521_v11  ;;  %vm76_vm7 = vcmp.eq.s32.totalorder %v40_v7, %v521_v11  ;;  %vm77_vm8 = vcmp.eq.s32.totalorder %v41_v8, %v521_v11  ;;  %vm94_vm10 = vcmp.eq.s32.totalorder %v58_v9, %v521_v11  ;;  %p447_p6 = pnand %p446_p5, %p440_p2 }
  0x2f   :  { %360 = vmatprep.subr.msk.bf16.mxu0 %vm359_vm4, %v469_v15  ;;  %vm361_vm9 = vmpackc.low %vm75_vm3, %vm74_vm2  ;;  %vm95_vm11 = vcmp.eq.s32.totalorder %v59_v10, %v521_v11  ;;  %v60_v16 = vadd.s32 176, %v510_v1  ;;  %v61_v17 = vadd.s32 184, %v510_v1  ;;  %vm78_vm15 = vcmp.eq.s32.totalorder %v42_v12, %v521_v11 }
  0x30   :  { %362 = vmatpush3.bf16.msk.msra.mxu0 %vm361_vm9, %v469_v15  ;;  %vm363_vm12 = vmpackc.low %vm93_vm6, %vm92_vm5  ;;  %vm79_vm0 = vcmp.eq.s32.totalorder %v43_v13, %v521_v11  ;;  %v44_v18 = vadd.s32 48, %v510_v1  ;;  %v45_v19 = vadd.s32 56, %v510_v1  ;;  %v62_v20 = vadd.s32 192, %v510_v1 }
  0x31   :  { %364 = vmatprep.subr.msk.bf16.mxu0 %vm363_vm12, %v469_v15  ;;  %vm365_vm13 = vmpackc.low %vm77_vm8, %vm76_vm7  ;;  %vm96_vm1 = vcmp.eq.s32.totalorder %v60_v16, %v521_v11  ;;  %vm97_vm2 = vcmp.eq.s32.totalorder %v61_v17, %v521_v11  ;;  %v63_v21 = vadd.s32 200, %v510_v1  ;;  %v46_v22 = vadd.s32 64, %v510_v1 }
  0x32   :  { %vm367_vm14 = vmpackc.low %vm95_vm11, %vm94_vm10  ;;  %vm80_vm5 = vcmp.eq.s32.totalorder %v44_v18, %v521_v11  ;;  %vm81_vm6 = vcmp.eq.s32.totalorder %v45_v19, %v521_v11  ;;  %v47_v23 = vadd.s32 72, %v510_v1  ;;  %vm98_vm7 = vcmp.eq.s32.totalorder %v62_v20, %v521_v11 }
  0x33   :  { %vm369_vm3 = vmpackc.low %vm79_vm0, %vm78_vm15  ;;  %vm99_vm8 = vcmp.eq.s32.totalorder %v63_v21, %v521_v11  ;;  %v64_v24 = vadd.s32 208, %v510_v1  ;;  %v65_v25 = vadd.s32 216, %v510_v1  ;;  %vm82_vm11 = vcmp.eq.s32.totalorder %v46_v22, %v521_v11 }
  0x34   :  { %366 = vmatpush3.bf16.msk.msra.mxu0 %vm365_vm13, %v469_v15  ;;  %vm371_vm4 = vmpackc.low %vm97_vm2, %vm96_vm1  ;;  %vm83_vm12 = vcmp.eq.s32.totalorder %v47_v23, %v521_v11  ;;  %v48_v26 = vadd.s32 80, %v510_v1  ;;  %v49_v27 = vadd.s32 88, %v510_v1  ;;  %v66_v28 = vadd.s32 224, %v510_v1 }
  0x35   :  { %368 = vmatprep.subr.msk.bf16.mxu0 %vm367_vm14, %v469_v15  ;;  %vm373_vm9 = vmpackc.low %vm81_vm6, %vm80_vm5  ;;  %vm100_vm13 = vcmp.eq.s32.totalorder %v64_v24, %v521_v11  ;;  %vm101_vm14 = vcmp.eq.s32.totalorder %v65_v25, %v521_v11  ;;  %v67_v29 = vadd.s32 232, %v510_v1  ;;  %v50_v30 = vadd.s32 96, %v510_v1 }
  0x36   :  { %vm375_vm10 = vmpackc.low %vm99_vm8, %vm98_vm7  ;;  %vm84_vm1 = vcmp.eq.s32.totalorder %v48_v26, %v521_v11  ;;  %vm85_vm2 = vcmp.eq.s32.totalorder %v49_v27, %v521_v11  ;;  %v51_v31 = vadd.s32 104, %v510_v1  ;;  %v68_v32 = vadd.s32 240, %v510_v1 }
  0x37   :  { %vm377_vm15 = vmpackc.low %vm83_vm12, %vm82_vm11  ;;  %v69_v33 = vadd.s32 248, %v510_v1  ;;  %vm86_vm7 = vcmp.eq.s32.totalorder %v50_v30, %v521_v11  ;;  %v52_v34 = vadd.s32 112, %v510_v1  ;;  %v53_v35 = vadd.s32 120, %v510_v1 }
  0x38   :  { %370 = vmatpush3.bf16.msk.msra.mxu0 %vm369_vm3, %v469_v15  ;;  %vm379_vm0 = vmpackc.low %vm101_vm14, %vm100_vm13  ;;  %vm102_vm3 = vcmp.eq.s32.totalorder %v66_v28, %v521_v11  ;;  %vm87_vm8 = vcmp.eq.s32.totalorder %v51_v31, %v521_v11 }
  0x39   :  { %372 = vmatprep.subr.msk.bf16.mxu0 %vm371_vm4, %v469_v15  ;;  %vm103_vm4 = vcmp.eq.s32.totalorder %v67_v29, %v521_v11  ;;  %vm381_vm5 = vmpackc.low %vm85_vm2, %vm84_vm1  ;;  %vm88_vm13 = vcmp.eq.s32.totalorder %v52_v34, %v521_v11  ;;  %vm89_vm14 = vcmp.eq.s32.totalorder %v53_v35, %v521_v11 }
  0x3a   :  { %vm383_vm6 = vmpackc.low %vm103_vm4, %vm102_vm3 }
  0x3b   :  { %vm385_vm11 = vmpackc.low %vm87_vm8, %vm86_vm7 }
  0x3c   :  { %374 = vmatpush3.bf16.msk.msra.mxu0 %vm373_vm9, %v469_v15  ;;  %vm104_vm9 = vcmp.eq.s32.totalorder %v68_v32, %v521_v11 }
  0x3d   :  { %376 = vmatprep.subr.msk.bf16.mxu0 %vm375_vm10, %v469_v15  ;;  %vm105_vm10 = vcmp.eq.s32.totalorder %v69_v33, %v521_v11 }
  0x3e   :  { %vm387_vm12 = vmpackc.low %vm105_vm10, %vm104_vm9 }
  0x40   :  { %378 = vmatpush3.bf16.msk.msra.mxu0 %vm377_vm15, %v469_v15  ;;  %vm389_vm15 = vmpackc.low %vm89_vm14, %vm88_vm13 }
  0x41   :  { %380 = vmatprep.subr.msk.bf16.mxu0 %vm379_vm0, %v469_v15 }
  0x44   :  { %382 = vmatpush3.bf16.msk.msra.mxu0 %vm381_vm5, %v469_v15 }
  0x45   :  { %384 = vmatprep.subr.msk.bf16.mxu0 %vm383_vm6, %v469_v15 }
  0x48   :  { %386 = vmatpush3.bf16.msk.msra.mxu0 %vm385_vm11, %v469_v15 }
  0x49   :  { %388 = vmatprep.subr.msk.bf16.mxu0 %vm387_vm12, %v469_v15 }
  0x4c   :  { %390 = vmatpush3.bf16.msk.msra.mxu0 %vm389_vm15, %v469_v15 }
  0x4f   :  { %237 = vmatmul.mubr.f32.vlgmr.msra.gmra.mrb[0].mxu0 %v170_v36 }
 0x122   :  { %v356_v37 = vpop.f32.mrb[0].mxu0 }
 0x123   :  { %v357_v38 = vpop.f32.mrb[1].mxu0 }
 0x124   :  { %v358_v39 = vadd.f32 %v357_v38, %v356_v37 }
 0x126   :  { %242 = vst [vmem:[#allocation7] sm:$0x1f] %v358_v39 }
 0x127   :  { %450 = shalt.err (!%p447_p6)
}
 0x128   :  { %s451_s9 = scalar_lea.hbm %s608_s2, 128 }
 0x129   :  { %p452_p7 = scmp.ne.s32.totalorder %s608_s2, %s451_s9  ;;  %p455_p8 = scmp.lt.u32.totalorder %s451_s9, %s608_s2 }
 0x12b   :  { %p457_p9 = pnand %p455_p8, %p452_p7 }
 0x12d   :  { %460 = shalt.err (!%p457_p9)
}
 0x12e   :  { %252 = dma.vmem_to_hbm [thread:$0]  %s250_s5, 128, %s608_s2, [#allocation4]  }
 0x12f   :  { %465 = dma.done.wait [#allocation4], 128  }
 0x130   :  { %466 = vsyncadd [#allocation4], 4294967168 }
 0x131   :  { %256 = vsyncpa [#allocation3], 1 }
 0x132   :  { %257 = vsyncpa [#allocation6], 1 }
 0x133   :  { %258 = vsyncpa [#allocation4], 1 }

</bundles_post_ra>
